<compile_context>
chip_gen: v7x
topology: tpu7x:2x2x1
jax: 0.10.0
libtpu: 0.0.40
codegen_flags: <defaults>
</compile_context>

<pallas_src>
import functools
import math

import numpy as np
import jax
import jax.numpy as jnp
from jax.experimental import pallas as pl
from jax.experimental.pallas import tpu as pltpu


def _pe_kernel(side_ref, w_ref, fp_ref, x_ref, o_ref, *, padding_idx, scale):
    """One (rt, lanes) tile: out = scale * x + PE(pos).

    side_ref: (rt, K)     bf16  [pos%256 | pos//256 | zero pad] per folded position
    w_ref   : (K, lanes)  bf16  group-indicator expansion weights {1, 256}
    fp_ref  : (2, lanes)  f32   row 0 = div_term per lane, row 1 = phase (0 or pi/2)
    x_ref   : (rt, lanes) input tile
    """
    # MXU: expand per-row positions to a lane-dense (rt, lanes) slab (exact in bf16).
    pos_e = jnp.dot(side_ref[...], w_ref[...], preferred_element_type=jnp.float32)

    freq = fp_ref[0:1, :]
    phase = fp_ref[1:2, :]
    arg = pos_e * freq + phase                      # cos(x) == sin(x + pi/2)
    # Rows that map to the all-zero padding row of `pe`.
    pe = jnp.where(pos_e == float(padding_idx), 0.0, jnp.sin(arg))

    o_ref[...] = (scale * x_ref[...].astype(jnp.float32) + pe).astype(o_ref.dtype)


def fixed_positional_encoding(x, mask, indices, *, max_len=5000):
    """x: (B, L, D); mask: (B, L) bool; indices: (B, L) int. Returns (B, L, D)."""
    B, L, D = x.shape
    padding_idx = max_len                       # pe has max_len+1 rows; last is zeros

    # ---- index prep on the tiny (B, L) stream --------------------------------------
    idx = indices.astype(jnp.int32)
    padded = jnp.where(mask, padding_idx, idx)
    padded = jnp.where(padded > padding_idx, padding_idx, padded)
    # PyTorch negative indices wrap around the (max_len+1)-row table.
    padded = jnp.where(padded < 0, padded + padding_idx + 1, padded)
    padded = jnp.clip(padded, 0, padding_idx)

    # ---- lane-dense folding: view (B, L, D) as (rows, fold*D) -----------------------
    fold = math.lcm(D, 128) // D
    if (B * L) % fold != 0:
        fold = 1                                # fallback (masked stores if D % 128 != 0)
    lanes = fold * D
    rows = (B * L) // fold
    x2 = x.reshape(rows, lanes)                 # contiguous reshape -> free

    # ---- side stream: (pos % 256, pos // 256) per folded position, bf16 -------------
    flat = padded.reshape(-1)
    lo = (flat % 256).astype(jnp.bfloat16).reshape(rows, fold)
    hi = (flat // 256).astype(jnp.bfloat16).reshape(rows, fold)
    side = jnp.concatenate([lo, hi], axis=1)    # (rows, 2*fold)
    k0 = 2 * fold
    K = max(16, -(-k0 // 16) * 16)              # pad contraction dim to the bf16 tile
    if K > k0:
        side = jnp.pad(side, ((0, 0), (0, K - k0)))

    # ---- MXU expansion weights: W[g, gD:(g+1)D] = 1 ; W[fold+g, gD:(g+1)D] = 256 -----
    w_np = np.zeros((K, lanes), np.float32)
    for g in range(fold):
        w_np[g, g * D:(g + 1) * D] = 1.0
        w_np[fold + g, g * D:(g + 1) * D] = 256.0
    w = jnp.asarray(w_np, dtype=jnp.bfloat16)

    # ---- per-lane freq / phase (same math as the PyTorch div_term) ------------------
    jj = np.arange(lanes) % D
    div_term = np.exp(np.arange(0, D, 2, dtype=np.float32)
                      * np.float32(-math.log(10000.0) / D))
    fp_np = np.stack([div_term[jj // 2].astype(np.float32),
                      ((jj % 2) * (0.5 * math.pi)).astype(np.float32)])
    fp = jnp.asarray(fp_np, dtype=jnp.float32)

    # ---- row tiling: explicit VMEM budget, >= 4 pipelined steps when possible -------
    lanes_pad = -(-lanes // 128) * 128
    bytes_x_row = lanes_pad * x.dtype.itemsize
    per_row = (2 * (2 * bytes_x_row + 128 * 2)      # x/out/side, double-buffered
               + 5 * lanes_pad * 4)                 # headroom for f32 intermediates
    budget = 26 * 1024 * 1024
    rt = max(8, (budget // per_row) // 8 * 8)
    if rows >= 32:
        rt = min(rt, max(8, (rows // 4) // 8 * 8))  # never collapse to a 1-step grid
    if rows <= 8:
        rt = rows                                   # block = full dim for tiny inputs
    else:
        rt = min(rt, (rows // 8) * 8)
    grid = (pl.cdiv(rows, rt),)

    vmem_need = (per_row * rt
                 + 2 * (K * lanes_pad * 2 + 8 * lanes_pad * 4)   # resident W + freq/phase
                 + (4 << 20))
    vmem_limit = int(min(48 << 20, max(16 << 20, vmem_need)))    # <= v7x 64 MiB physical

    kernel = functools.partial(_pe_kernel, padding_idx=padding_idx,
                               scale=math.sqrt(float(D)))

    out2 = pl.pallas_call(
        kernel,
        out_shape=jax.ShapeDtypeStruct((rows, lanes), x.dtype),
        grid_spec=pltpu.PrefetchScalarGridSpec(
            num_scalar_prefetch=0,
            grid=grid,
            in_specs=[
                pl.BlockSpec((rt, K), lambda r: (r, 0)),       # side (bf16, skinny)
                pl.BlockSpec((K, lanes), lambda r: (0, 0)),    # W (resident)
                pl.BlockSpec((2, lanes), lambda r: (0, 0)),    # freq/phase (resident)
                pl.BlockSpec((rt, lanes), lambda r: (r, 0)),   # x tile
            ],
            out_specs=pl.BlockSpec((rt, lanes), lambda r: (r, 0)),
        ),
        compiler_params=pltpu.CompilerParams(
            dimension_semantics=("parallel",),
            vmem_limit_bytes=vmem_limit,
        ),
    )(side, w, fp, x2)
    return out2.reshape(B, L, D)


def _reference(x, mask, indices, *, max_len=5000):
    """Pure-JAX reference that builds the pe table exactly like the PyTorch init."""
    D = x.shape[-1]
    position = jnp.arange(0.0, max_len)[:, None]
    div_term = jnp.exp(jnp.arange(0.0, D, 2) * -(math.log(10000.0) / D))
    pe = jnp.zeros((max_len, D), jnp.float32)
    pe = pe.at[:, 0::2].set(jnp.sin(position * div_term))
    pe = pe.at[:, 1::2].set(jnp.cos(position * div_term))
    pe = jnp.concatenate([pe, jnp.zeros((1, D), jnp.float32)], axis=0)
    padding_idx = pe.shape[0] - 1
    padded = jnp.where(mask, padding_idx, indices)
    padded = jnp.where(padded > padding_idx, padding_idx, padded)
    return math.sqrt(D) * x + pe[padded, :]


if __name__ == "__main__":
    key = jax.random.PRNGKey(0)
    kx, ki, km, kx2, ki2, km2 = jax.random.split(key, 6)

    MAX_LEN = 64

    # Case 1: d_model=32 exercises the lane-dense fold (fold=4) + MXU position expansion.
    B, L, D = 2, 16, 32
    x = jax.random.normal(kx, (B, L, D), dtype=jnp.float32)
    indices = jax.random.randint(ki, (B, L), 0, MAX_LEN + 10)   # some exceed padding_idx
    mask = jax.random.bernoulli(km, 0.3, (B, L))

    out = jax.block_until_ready(
        fixed_positional_encoding(x, mask, indices, max_len=MAX_LEN))
    ref = _reference(x, mask, indices, max_len=MAX_LEN)
    assert out.shape == (B, L, D) and out.dtype == x.dtype
    assert jnp.allclose(out, ref, atol=1e-4, rtol=1e-4), "mismatch (folded path)"

    # Case 2: d_model=128 exercises the fold=1 path and a multi-step pipelined grid.
    B2, L2, D2 = 2, 64, 128
    x2 = jax.random.normal(kx2, (B2, L2, D2), dtype=jnp.float32)
    indices2 = jax.random.randint(ki2, (B2, L2), 0, MAX_LEN + 10)
    mask2 = jax.random.bernoulli(km2, 0.3, (B2, L2))
    out2 = jax.block_until_ready(
        fixed_positional_encoding(x2, mask2, indices2, max_len=MAX_LEN))
    ref2 = _reference(x2, mask2, indices2, max_len=MAX_LEN)
    assert jnp.allclose(out2, ref2, atol=1e-4, rtol=1e-4), "mismatch (fold=1 path)"

    print("KERNEL_OK")
</pallas_src>

<mosaic_0001>
module attributes {stable_mosaic.version = 11 : i64} {
  func.func @_pe_kernel(%arg0: i32, %arg1: memref<8x16xbf16, #tpu.memory_space<vmem>>, %arg2: memref<16x128xbf16, #tpu.memory_space<vmem>>, %arg3: memref<2x128xf32, #tpu.memory_space<vmem>>, %arg4: memref<8x128xf32, #tpu.memory_space<vmem>>, %arg5: memref<8x128xf32, #tpu.memory_space<vmem>>) attributes {dimension_semantics = [#tpu.dimension_semantics<parallel>], iteration_bounds = array<i64: 1>, scalar_prefetch = 0 : i64, scratch_operands = 0 : i64, tpu.core_type = #tpu.core_type<tc>, window_params = [{transform_indices = @transform_0, window_bounds = array<i64: 8, 16>}, {pipeline_mode = #tpu.pipeline_mode<synchronous>, transform_indices = @transform_1, window_bounds = array<i64: 16, 128>}, {pipeline_mode = #tpu.pipeline_mode<synchronous>, transform_indices = @transform_2, window_bounds = array<i64: 2, 128>}, {transform_indices = @transform_3, window_bounds = array<i64: 8, 128>}, {transform_indices = @transform_4, window_bounds = array<i64: 8, 128>}]} {
    %c0 = arith.constant 0 : index
    %c0_0 = arith.constant 0 : index
    %0 = vector.load %arg1[%c0, %c0_0] : memref<8x16xbf16, #tpu.memory_space<vmem>>, vector<8x16xbf16>
    %c0_1 = arith.constant 0 : index
    %c0_2 = arith.constant 0 : index
    %1 = vector.load %arg2[%c0_1, %c0_2] : memref<16x128xbf16, #tpu.memory_space<vmem>>, vector<16x128xbf16>
    %cst = arith.constant dense<0.000000e+00> : vector<8x128xf32>
    %2 = tpu.matmul %0, %1, %cst {dimension_numbers = #tpu.dot_dimension_numbers<[1], [0], [0], [1], [0, 0, 1, 1], [], []>} : vector<8x16xbf16>, vector<16x128xbf16>, vector<8x128xf32> -> vector<8x128xf32>
    %c0_3 = arith.constant 0 : index
    %c0_4 = arith.constant 0 : index
    %3 = vector.load %arg3[%c0_3, %c0_4] : memref<2x128xf32, #tpu.memory_space<vmem>>, vector<1x128xf32>
    %c1 = arith.constant 1 : index
    %c0_5 = arith.constant 0 : index
    %4 = vector.load %arg3[%c1, %c0_5] : memref<2x128xf32, #tpu.memory_space<vmem>>, vector<1x128xf32>
    %5 = vector.broadcast %3 : vector<1x128xf32> to vector<8x128xf32>
    %6 = arith.mulf %2, %5 : vector<8x128xf32>
    %7 = vector.broadcast %4 : vector<1x128xf32> to vector<8x128xf32>
    %8 = arith.addf %6, %7 : vector<8x128xf32>
    %cst_6 = arith.constant 6.400000e+01 : f32
    %9 = vector.broadcast %cst_6 : f32 to vector<8x128xf32>
    %10 = arith.cmpf oeq, %2, %9 : vector<8x128xf32>
    %11 = math.sin %8 : vector<8x128xf32>
    %cst_7 = arith.constant 0.000000e+00 : f32
    %12 = vector.broadcast %cst_7 : f32 to vector<8x128xf32>
    %13 = arith.select %10, %12, %11 : vector<8x128xi1>, vector<8x128xf32>
    %c0_8 = arith.constant 0 : index
    %c0_9 = arith.constant 0 : index
    %14 = vector.load %arg4[%c0_8, %c0_9] : memref<8x128xf32, #tpu.memory_space<vmem>>, vector<8x128xf32>
    %cst_10 = arith.constant 5.65685415 : f32
    %15 = vector.broadcast %cst_10 : f32 to vector<8x128xf32>
    %16 = arith.mulf %15, %14 : vector<8x128xf32>
    %17 = arith.addf %16, %13 : vector<8x128xf32>
    %c0_11 = arith.constant 0 : index
    %c0_12 = arith.constant 0 : index
    %18 = vector.load %arg5[%c0_11, %c0_12] : memref<8x128xf32, #tpu.memory_space<vmem>>, vector<8x128xf32>
    tpu.vector_store %arg5[%c0_11, %c0_12], %17 {strides = array<i32>} : memref<8x128xf32, #tpu.memory_space<vmem>>, vector<8x128xf32>,
    return
  }
  func.func @transform_0(%arg0: i32) -> (i32, i32) {
    %c0_i32 = arith.constant 0 : i32
    %c0_i32_0 = arith.constant 0 : i32
    return %arg0, %c0_i32 : i32, i32
  }
  func.func @transform_1(%arg0: i32) -> (i32, i32) {
    %c0_i32 = arith.constant 0 : i32
    %c0_i32_0 = arith.constant 0 : i32
    %c0_i32_1 = arith.constant 0 : i32
    return %c0_i32, %c0_i32_0 : i32, i32
  }
  func.func @transform_2(%arg0: i32) -> (i32, i32) {
    %c0_i32 = arith.constant 0 : i32
    %c0_i32_0 = arith.constant 0 : i32
    %c0_i32_1 = arith.constant 0 : i32
    return %c0_i32, %c0_i32_0 : i32, i32
  }
  func.func @transform_3(%arg0: i32) -> (i32, i32) {
    %c0_i32 = arith.constant 0 : i32
    %c0_i32_0 = arith.constant 0 : i32
    return %arg0, %c0_i32 : i32, i32
  }
  func.func @transform_4(%arg0: i32) -> (i32, i32) {
    %c0_i32 = arith.constant 0 : i32
    %c0_i32_0 = arith.constant 0 : i32
    return %arg0, %c0_i32 : i32, i32
  }
}

</mosaic_0001>

<bundles_post_ra>
// kernel: tpu_custom_call.1
= control target key start
LH: loop header
LB: loop body
LE: loop exit
PB: predicated region body
PF: predicated region fallthrough
CT: control target
= control target key end

     0   :  { %9 = vsyncpa [#allocation3], 0  ;;  %s461_s0 = inlined_call_operand.hbm [shape: bf16[8,16], index: 0, kind: input, shape index: {}]   ;;  %s462_s1 = inlined_call_operand.hbm [shape: bf16[16,128], index: 1, kind: input, shape index: {}]   ;;  %s463_s2 = inlined_call_operand.vmem [shape: f32[2,128], index: 2, kind: input, shape index: {}]   ;;  %s464_s3 = inlined_call_operand.vmem [shape: f32[8,128], index: 3, kind: input, shape index: {}]   ;;  %s465_s4 = inlined_call_operand.hbm [shape: f32[8,128], index: 4, kind: output, shape index: {}]  }
   0x1   :  { %10 = vsyncpa [#allocation6], 0 }
   0x2   :  { %11 = vsyncpa [#allocation4], 0  ;;  %s346_s15 = smov [#allocation2]   ;;  %s347_s17 = smov [#allocation5]  }
   0x3   :  { %s18_s16 = sshll.u32 %s346_s15, 4  ;;  %s27_s18 = sshll.u32 %s347_s17, 4  ;;  %s19_s16 = int_to_ptr.vmem [resolvable:$true] %s18_s16  ;;  %s384_s18 = int_to_ptr.vmem [resolvable:$true] %s27_s18 }
   0x4   :  { %s274_s21 = scalar_lea.hbm %s461_s0, 64 }
   0x5   :  { %p275_p0 = scmp.ne.s32.totalorder %s461_s0, %s274_s21  ;;  %p278_p1 = scmp.lt.u32.totalorder %s274_s21, %s461_s0 }
   0x7   :  { %p280_p2 = pnand %p278_p1, %p275_p0 }
   0x9   :  { %283 = shalt.err (!%p280_p2)
}
   0xa   :  { %s284_s26 = scalar_lea.vmem %s19_s16, 64  ;;  %p289_p4 = scmp.lt.s32.totalorder %s19_s16, %s19_s16 }
   0xb   :  { %p285_p3 = scmp.ne.s32.totalorder %s19_s16, %s284_s26  ;;  %p290_p5 = scmp.lt.s32.totalorder %s284_s26, %s284_s26 }
   0xd   :  { %p291_p6 = por %p290_p5, %p289_p4 }
   0xf   :  { %p292_p7 = pnand %p291_p6, %p285_p3 }
  0x11   :  { %295 = shalt.err (!%p292_p7)
}
  0x12   :  { %21 = dma.hbm_to_vmem [thread:$0]  %s461_s0, 64, %s19_s16, [#allocation3]  }
  0x13   :  { %s296_s5 = scalar_lea.hbm %s462_s1, 128 }
  0x14   :  { %p297_p8 = scmp.ne.s32.totalorder %s462_s1, %s296_s5  ;;  %p300_p9 = scmp.lt.u32.totalorder %s296_s5, %s462_s1 }
  0x16   :  { %p302_p10 = pnand %p300_p9, %p297_p8 }
  0x18   :  { %305 = shalt.err (!%p302_p10)
}
  0x19   :  { %s306_s10 = scalar_lea.vmem %s384_s18, 128  ;;  %p311_p12 = scmp.lt.s32.totalorder %s384_s18, %s384_s18 }
  0x1a   :  { %p307_p11 = scmp.ne.s32.totalorder %s384_s18, %s306_s10  ;;  %p312_p13 = scmp.lt.s32.totalorder %s306_s10, %s306_s10 }
  0x1c   :  { %p313_p0 = por %p312_p13, %p311_p12 }
  0x1e   :  { %p314_p1 = pnand %p313_p0, %p307_p11 }
  0x20   :  { %317 = shalt.err (!%p314_p1)
}
  0x21   :  { %s348_s0 = smov 64   ;;  %s349_s11 = smov 4  }
  0x22   :  { %33 = dma.hbm_to_vmem [thread:$0]  %s462_s1, 128, %s384_s18, [#allocation6], %s348_s0, %s348_s0, %s349_s11  }
  0x23   :  { %340 = dma.done.wait [#allocation3], 64  }
  0x24   :  { %341 = vsyncadd [#allocation3], 4294967232 }
  0x25   :  { %342 = dma.done.wait [#allocation6], 128  }
  0x26   :  { %343 = vsyncadd [#allocation6], 4294967168  ;;  %v350_v0 = vmov 0.0   ;;  %vm351_vm0 = vmmov 0   ;;  %v269_v1 = vld [vmem:[#allocation5] sm:$0xff]   ;;  %vm54_vm1 = vcmask 130048  }
  0x27   :  { %246 = vmatprep.subr.bf16.mxu0 %v350_v0  ;;  %248 = vmatprep.mubr.msk.bf16.mxu0 %vm351_vm0, %v350_v0  ;;  %v45_v2 = vld [vmem:[#allocation2] sm:$0xf]  ;;  %v238_v3 = vld [vmem:[%s463_s2] ss:$0 sm:$0xff]  ;;  %v239_v5 = vld [vmem:[%s463_s2 + $0x1] ss:$0 sm:$0xff] }
  0x28   :  { %247 = vmatpush3.bf16.msra.mxu0 %v269_v1  ;;  %v352_v21 = vmov 683565275   ;;  %v353_v23 = vmov 2475754826   ;;  %v354_v26 = vmov 2131351028  }
  0x29   :  { %v355_v29 = vmov 2102212464   ;;  %v356_v32 = vmov 920167782   ;;  %v357_v35 = vmov 1326507024  }
  0x2a   :  { %s358_s18 = smov [#allocation7]  }
  0x2b   :  { %249 = vmatmul.mubr.msk.bf16.vlgmr.msra.gmra.mrb[0].mxu0 %vm54_vm1, %v45_v2  ;;  %s226_s19 = sshll.u32 %s358_s18, 4  ;;  %s227_s19 = int_to_ptr.vmem [resolvable:$true] %s226_s19 }
  0x2c   :  { %p323_p3 = scmp.lt.s32.totalorder %s227_s19, %s227_s19 }
  0xfe   :  { %v418_v4 = vpop.f32.mrb[0].mxu0 }
  0xff   :  { %v104_v6 = vmul.f32 %v238_v3, %v418_v4  ;;  %v250_v7 = vpop.f32.mrb[1].mxu0  ;;  %vm110_vm15 = vcmp.eq.f32.partialorder %v418_v4, 64.0 }
 0x100   :  { %v95_v8 = vpop.f32.mrb[2].mxu0 }
 0x101   :  { %v424_v9 = vadd.f32 %v239_v5, %v104_v6  ;;  %v251_v10 = vpop.f32.mrb[3].mxu0 }
 0x103   :  { %v114_v11 = vand.u32 2139095040, %v424_v9  ;;  %v111_v15 = vand.u32 2147483647, %v424_v9  ;;  %vm113_vm9 = vcmp.lt.s32.totalorder %v424_v9, 0  ;;  %vm203_vm14 = vweird.f32 %v424_v9 }
 0x105   :  { %v115_v12 = vshrl.u32 %v114_v11, 23  ;;  %v118_v18 = vand.u32 8388607, %v111_v15  ;;  %vm112_vm10 = vcmp.le.f32.partialorder %v111_v15, 0.7853982 }
 0x107   :  { %v240_v13 = vadd.s32 4294967169, %v115_v12  ;;  %v119_v37 = vor.u32 8388608, %v118_v18 }
 0x109   :  { %v121_v14 = vadd.s32 1, %v240_v13  ;;  %v159_v51 = vshll.u32 %v119_v37, 8 }
 0x10b   :  { %vm122_vm2 = vcmp.gt.s32.totalorder %v121_v14, 0 }
 0x10c   :  { %v123_v16 = vsel %vm122_vm2, %v121_v14, 0 }
 0x10d   :  { %v125_v17 = vand.u32 31, %v123_v16  ;;  %v124_v20 = vshrl.u32 %v123_v16, 5 }
 0x10f   :  { %v126_v19 = vsub.s32 32, %v125_v17  ;;  %v128_v22 = vshll.u32 %v352_v21, %v125_v17  ;;  %v131_v24 = vshll.u32 %v353_v23, %v125_v17  ;;  %v134_v28 = vshll.u32 %v354_v26, %v125_v17 }
 0x110   :  { %v137_v31 = vshll.u32 %v355_v29, %v125_v17  ;;  %v140_v34 = vshll.u32 %v356_v32, %v125_v17  ;;  %vm143_vm3 = vcmp.lt.s32.totalorder %v124_v20, 1  ;;  %vm146_vm4 = vcmp.lt.s32.totalorder %v124_v20, 4 }
 0x111   :  { %v129_v25 = vshrl.u32 %v353_v23, %v126_v19  ;;  %v132_v27 = vshrl.u32 %v354_v26, %v126_v19  ;;  %v135_v30 = vshrl.u32 %v355_v29, %v126_v19  ;;  %v138_v33 = vshrl.u32 %v356_v32, %v126_v19 }
 0x112   :  { %v141_v36 = vshrl.u32 %v357_v35, %v126_v19  ;;  %v127_v46 = vshrl.u32 %v352_v21, %v126_v19  ;;  %vm145_vm5 = vcmp.lt.s32.totalorder %v124_v20, 3  ;;  %vm144_vm6 = vcmp.lt.s32.totalorder %v124_v20, 2 }
 0x113   :  { %v130_v38 = vor.u32 %v129_v25, %v128_v22  ;;  %v133_v39 = vor.u32 %v132_v27, %v131_v24  ;;  %v136_v40 = vor.u32 %v135_v30, %v134_v28  ;;  %v139_v41 = vor.u32 %v138_v33, %v137_v31 }
 0x114   :  { %v142_v42 = vor.u32 %v141_v36, %v140_v34  ;;  %v216_v36 = vld [vmem:[%s464_s3] sm:$0xff]  ;;  %s318_s3 = scalar_lea.vmem %s227_s19, 128 }
 0x115   :  { %v148_v43 = vsel %vm146_vm4, %v136_v40, 2102212464  ;;  %v151_v44 = vsel %vm143_vm3, %v130_v38, %v133_v39  ;;  %v155_v45 = vsel %vm143_vm3, %v133_v39, %v136_v40  ;;  %v152_v47 = vsel %vm146_vm4, %v139_v41, 920167782  ;;  %p319_p2 = scmp.ne.s32.totalorder %s227_s19, %s318_s3  ;;  %p324_p4 = scmp.lt.s32.totalorder %s318_s3, %s318_s3 }
 0x116   :  { %v156_v48 = vsel %vm146_vm4, %v142_v42, 1326507024  ;;  %v153_v49 = vsel %vm145_vm5, %v136_v40, %v152_v47  ;;  %v147_v52 = vsel %vm143_vm3, %v127_v46, %v130_v38  ;;  %v149_v53 = vsel %vm145_vm5, %v133_v39, %v148_v43 }
 0x117   :  { %v157_v50 = vsel %vm145_vm5, %v139_v41, %v156_v48  ;;  %v154_v54 = vsel %vm144_vm6, %v151_v44, %v153_v49  ;;  %v150_v60 = vsel %vm144_vm6, %v147_v52, %v149_v53  ;;  %v217_v39 = vmul.f32 5.656854, %v216_v36  ;;  %p325_p5 = por %p324_p4, %p323_p3 }
 0x118   :  { %v158_v55 = vsel %vm144_vm6, %v155_v45, %v157_v50  ;;  %v433_v58 = vmul.u32.u64.low %v159_v51, %v154_v54  ;;  %v434_v59 = vmul.u32.u64.high %v159_v51, %v154_v54, %v433_v58  ;;  %v166_v62 = vmul.u32 %v159_v51, %v150_v60 }
 0x119   :  { %v430_v56 = vmul.u32.u64.low %v159_v51, %v158_v55  ;;  %v431_v57 = vmul.u32.u64.high %v159_v51, %v158_v55, %v430_v56  ;;  %p326_p6 = pnand %p325_p5, %p319_p2 }
 0x11a   :  { %v169_v61 = vadd.s32 1, %v434_v59 }
 0x11b   :  { %vm168_vm7 = vc.u32 %v431_v57, %v433_v58  ;;  %v167_v12 = vadd.s32 %v433_v58, %v431_v57 }
 0x11c   :  { %v170_v63 = vsel %vm168_vm7, %v169_v61, %v434_v59 }
 0x11d   :  { %v171_v0 = vadd.s32 %v170_v63, %v166_v62 }
 0x11f   :  { %v172_v1 = vadd.s32 536870912, %v171_v0 }
 0x121   :  { %v173_v2 = vshrl.u32 %v172_v1, 30 }
 0x123   :  { %v174_v3 = vshll.u32 %v173_v2, 30  ;;  %v197_v25 = vsub.s32 4, %v173_v2 }
 0x125   :  { %v175_v5 = vsub.s32 %v171_v0, %v174_v3  ;;  %v198_v28 = vsel %vm113_vm9, %v197_v25, %v173_v2 }
 0x126   :  { %v200_v30 = vsel %vm112_vm10, 0, %v198_v28 }
 0x127   :  { %v177_v6 = vsub.s32 0, %v175_v5  ;;  %v204_v31 = vadd.s32 3, %v200_v30 }
 0x129   :  { %v241_v7 = vmin.u32 %v177_v6, %v175_v5  ;;  %v205_v32 = vand.u32 3, %v204_v31 }
 0x12b   :  { %v179_v8 = vclz %v241_v7  ;;  %vm210_vm11 = vcmp.eq.s32.totalorder %v205_v32, 2  ;;  %vm207_vm12 = vcmp.eq.s32.totalorder %v205_v32, 0  ;;  %vm206_vm13 = vcmp.lt.s32.totalorder %v205_v32, 2 }
 0x12d   :  { %v242_v10 = vadd.s32 4294967294, %v179_v8 }
 0x12f   :  { %vm243_vm8 = vcmp.lt.s32.totalorder %v242_v10, 0 }
 0x130   :  { %v182_v11 = vsel %vm243_vm8, 0, %v242_v10 }
 0x131   :  { %v183_v13 = vsub.s32 32, %v182_v11  ;;  %v187_v14 = vsub.s32 4294967266, %v182_v11  ;;  %v184_v16 = vshll.u32 %v175_v5, %v182_v11 }
 0x133   :  { %v185_v17 = vshrl.u32 %v167_v12, %v183_v13  ;;  %v188_v18 = vadd.s32 127, %v187_v14 }
 0x135   :  { %v186_v19 = vor.u32 %v185_v17, %v184_v16  ;;  %v189_v20 = vshll.u32 %v188_v18, 23 }
 0x137   :  { %v190_v21 = vor.u32 4788187, %v189_v20  ;;  %v193_v23 = vcvt.s32.f32 %v186_v19 }
 0x139   :  { %v191_v22 = vand.u32 2147483647, %v190_v21 }
 0x13b   :  { %v194_v24 = vmul.f32 %v193_v23, %v191_v22 }
 0x13d   :  { %v195_v26 = vxor.u32 2147483648, %v194_v24 }
 0x13f   :  { %v196_v27 = vsel %vm113_vm9, %v195_v26, %v194_v24 }
 0x140   :  { %v199_v29 = vsel %vm112_vm10, %v424_v9, %v196_v27 }
 0x141   :  { %270 = vcosq.f32 %v199_v29 }
 0x142   :  { %272 = vsinq.f32 %v199_v29 }
 0x14b   :  { %v271_v33 = vpop.eup %270 }
 0x14c   :  { %v273_v34 = vpop.eup %272  ;;  %v211_v35 = vxor.u32 2147483648, %v271_v33 }
 0x14d   :  { %v208_v37 = vxor.u32 2147483648, %v273_v34 }
 0x14e   :  { %v212_v15 = vsel %vm210_vm11, %v211_v35, %v273_v34 }
 0x14f   :  { %v209_v38 = vsel %vm207_vm12, %v271_v33, %v208_v37 }
 0x150   :  { %v213_v40 = vsel %vm206_vm13, %v209_v38, %v212_v15 }
 0x151   :  { %v214_v41 = vsel %vm203_vm14, nan, %v213_v40 }
 0x152   :  { %v215_v42 = vsel %vm110_vm15, 0.0, %v214_v41 }
 0x153   :  { %v218_v43 = vadd.f32 %v217_v39, %v215_v42 }
 0x155   :  { %219 = vst [vmem:[#allocation7] sm:$0xff] %v218_v43 }
 0x156   :  { %329 = shalt.err (!%p326_p6)
}
 0x157   :  { %s330_s22 = scalar_lea.hbm %s465_s4, 128 }
 0x158   :  { %p331_p7 = scmp.ne.s32.totalorder %s465_s4, %s330_s22  ;;  %p334_p8 = scmp.lt.u32.totalorder %s330_s22, %s465_s4 }
 0x15a   :  { %p336_p9 = pnand %p334_p8, %p331_p7 }
 0x15c   :  { %339 = shalt.err (!%p336_p9)
}
 0x15d   :  { %229 = dma.vmem_to_hbm [thread:$0]  %s227_s19, 128, %s465_s4, [#allocation4]  }
 0x15e   :  { %344 = dma.done.wait [#allocation4], 128  }
 0x15f   :  { %345 = vsyncadd [#allocation4], 4294967168 }
 0x160   :  { %233 = vsyncpa [#allocation3], 1 }
 0x161   :  { %234 = vsyncpa [#allocation6], 1 }
 0x162   :  { %235 = vsyncpa [#allocation4], 1 }

</bundles_post_ra>
